<compile_context>
chip_gen: v5e
topology: v5e:2x2
jax: 0.10.0
libtpu: 0.0.40
codegen_flags: <defaults>
</compile_context>

<pallas_src>
import jax
import jax.numpy as jnp
from jax.experimental import pallas as pl
from jax.experimental.pallas import tpu as pltpu


def _round_up(x, m):
    return ((x + m - 1) // m) * m


def _policy_kernel(x_ref, w1_ref, b1_ref, w2_ref, b2_ref, w3_ref, b3_ref, out_ref):
    """One batch tile of the MLP + tanh. Weights are bf16, accumulation f32."""
    # Layer 1: Linear + ReLU  (bf16 operands -> f32 accumulate)
    x = x_ref[...].astype(jnp.bfloat16)
    h = jnp.dot(x, w1_ref[...], preferred_element_type=jnp.float32) + b1_ref[...]
    h = jnp.maximum(h, 0.0)

    # Layer 2: Linear + ReLU
    h = jnp.dot(h.astype(jnp.bfloat16), w2_ref[...],
                preferred_element_type=jnp.float32) + b2_ref[...]
    h = jnp.maximum(h, 0.0)

    # Output layer (already pre-sliced to the mean half + lane-padded).
    y = jnp.dot(h.astype(jnp.bfloat16), w3_ref[...],
                preferred_element_type=jnp.float32) + b3_ref[...]

    # tanh of the whole lane-dense block; wrapper slices to action_dim.
    out_ref[...] = jnp.tanh(y)


def prepare_params(params, state_dim, action_dim):
    """Convert f32 [in,out] params into kernel-ready form:
       - weights cast to bf16, biases kept f32 (shape [1, out]),
       - w1 rows zero-padded so K is a multiple of 128,
       - w3/b3 pre-sliced to the mean half and zero-padded to a multiple of
         128 output lanes (lane-dense store)."""
    w1, b1, w2, b2, w3, b3 = params

    k_pad = _round_up(state_dim, 128)
    if k_pad != state_dim:
        w1 = jnp.pad(w1, ((0, k_pad - state_dim), (0, 0)))

    # Keep only the "mean" half of the output layer (chunk(2)[0]), pad lanes.
    w3m = w3[:, :action_dim]
    b3m = b3[:, :action_dim]
    n_pad = _round_up(action_dim, 128)
    if n_pad != action_dim:
        w3m = jnp.pad(w3m, ((0, 0), (0, n_pad - action_dim)))
        b3m = jnp.pad(b3m, ((0, 0), (0, n_pad - action_dim)))

    return (w1.astype(jnp.bfloat16), b1.astype(jnp.float32),
            w2.astype(jnp.bfloat16), b2.astype(jnp.float32),
            w3m.astype(jnp.bfloat16), b3m.astype(jnp.float32))


def state_dependent_policy_forward(states, kernel_params, action_dim, *, tile_b=256):
    """Pallas wrapper. states: [B, state_dim] f32. Returns [B, action_dim] f32.

    kernel_params must come from prepare_params()."""
    w1, b1, w2, b2, w3, b3 = kernel_params
    B, state_dim = states.shape
    k_pad = w1.shape[0]
    n_pad = w3.shape[1]

    # Pick a batch tile: multiple of 8, no bigger than needed.
    tile_b = min(tile_b, _round_up(B, 8))
    b_pad = _round_up(B, tile_b)

    x = states.astype(jnp.float32)
    if (b_pad != B) or (k_pad != state_dim):
        x = jnp.pad(x, ((0, b_pad - B), (0, k_pad - state_dim)))

    grid = (pl.cdiv(b_pad, tile_b),)

    # Weights/biases: constant block index -> stay resident in VMEM across the
    # batch grid; only the state/out tiles are pipelined.
    resident = lambda arr: pl.BlockSpec(arr.shape, lambda i: (0, 0))

    out = pl.pallas_call(
        _policy_kernel,
        out_shape=jax.ShapeDtypeStruct((b_pad, n_pad), jnp.float32),
        grid=grid,
        in_specs=[
            pl.BlockSpec((tile_b, k_pad), lambda i: (i, 0)),
            resident(w1), resident(b1),
            resident(w2), resident(b2),
            resident(w3), resident(b3),
        ],
        out_specs=pl.BlockSpec((tile_b, n_pad), lambda i: (i, 0)),
        compiler_params=pltpu.CompilerParams(
            # Batch tiles are independent: shard across TCs on v7x (no-op on
            # v5e/v6e). Keep TILE_B modest (<= a few K rows) so double-buffered
            # activations + ~160 KB bf16 weights fit v7x's 64 MiB VMEM.
            dimension_semantics=("parallel",),
        ),
    )(x, w1, b1, w2, b2, w3, b3)

    return out[:B, :action_dim]


def init_params(key, state_dim, action_dim, hidden_units=(256, 256)):
    """Deterministic synthetic parameters. Weights stored as [in, out], f32."""
    dims = [state_dim, *hidden_units, 2 * action_dim]
    params = []
    for i in range(len(dims) - 1):
        key, kw, kb = jax.random.split(key, 3)
        fan_in = dims[i]
        scale = 1.0 / jnp.sqrt(jnp.float32(fan_in))
        w = jax.random.uniform(kw, (dims[i], dims[i + 1]), jnp.float32,
                               minval=-scale, maxval=scale)
        b = jax.random.uniform(kb, (1, dims[i + 1]), jnp.float32,
                               minval=-scale, maxval=scale)
        params += [w, b]
    return tuple(params)


def reference_forward(states, params, action_dim):
    """Plain-JAX f32 reference for correctness check."""
    w1, b1, w2, b2, w3, b3 = params
    h = jnp.maximum(states @ w1 + b1, 0.0)
    h = jnp.maximum(h @ w2 + b2, 0.0)
    y = h @ w3 + b3
    return jnp.tanh(y[:, :action_dim])


if __name__ == "__main__":
    # Small SAC-like setup: batch=8, state_dim=32, action_dim=8, hidden=(256, 256)
    B, STATE_DIM, ACTION_DIM = 8, 32, 8
    HIDDEN = (256, 256)

    key = jax.random.PRNGKey(0)
    key, ks = jax.random.split(key)
    states = jax.random.normal(ks, (B, STATE_DIM), jnp.float32)
    params = init_params(key, STATE_DIM, ACTION_DIM, HIDDEN)
    kparams = prepare_params(params, STATE_DIM, ACTION_DIM)

    out = state_dependent_policy_forward(states, kparams, ACTION_DIM)
    out = jax.block_until_ready(out)
    ref = reference_forward(states, params, ACTION_DIM)
    assert out.shape == (B, ACTION_DIM)
    # bf16 matmul operands (f32 accumulate) -> loosened tolerance vs f32 reference.
    assert jnp.allclose(out, ref, atol=2e-2, rtol=2e-2), "mismatch vs reference"

    # Second check exercising the batch grid (>1 tile) and row padding.
    B2 = 40
    key, ks2 = jax.random.split(key)
    states2 = jax.random.normal(ks2, (B2, STATE_DIM), jnp.float32)
    out2 = state_dependent_policy_forward(states2, kparams, ACTION_DIM, tile_b=16)
    out2 = jax.block_until_ready(out2)
    ref2 = reference_forward(states2, params, ACTION_DIM)
    assert out2.shape == (B2, ACTION_DIM)
    assert jnp.allclose(out2, ref2, atol=2e-2, rtol=2e-2), "mismatch vs reference (grid)"

    print("KERNEL_OK")
</pallas_src>

<mosaic_0001>
module attributes {stable_mosaic.version = 11 : i64} {
  func.func @_policy_kernel(%arg0: i32, %arg1: memref<8x128xf32, #tpu.memory_space<vmem>>, %arg2: memref<128x256xbf16, #tpu.memory_space<vmem>>, %arg3: memref<1x256xf32, #tpu.memory_space<vmem>>, %arg4: memref<256x256xbf16, #tpu.memory_space<vmem>>, %arg5: memref<1x256xf32, #tpu.memory_space<vmem>>, %arg6: memref<256x128xbf16, #tpu.memory_space<vmem>>, %arg7: memref<1x128xf32, #tpu.memory_space<vmem>>, %arg8: memref<8x128xf32, #tpu.memory_space<vmem>>) attributes {dimension_semantics = [#tpu.dimension_semantics<parallel>], iteration_bounds = array<i64: 1>, scalar_prefetch = 0 : i64, scratch_operands = 0 : i64, tpu.core_type = #tpu.core_type<tc>, window_params = [{transform_indices = @transform_0, window_bounds = array<i64: 8, 128>}, {pipeline_mode = #tpu.pipeline_mode<synchronous>, transform_indices = @transform_1, window_bounds = array<i64: 128, 256>}, {pipeline_mode = #tpu.pipeline_mode<synchronous>, transform_indices = @transform_2, window_bounds = array<i64: 1, 256>}, {pipeline_mode = #tpu.pipeline_mode<synchronous>, transform_indices = @transform_3, window_bounds = array<i64: 256, 256>}, {pipeline_mode = #tpu.pipeline_mode<synchronous>, transform_indices = @transform_4, window_bounds = array<i64: 1, 256>}, {pipeline_mode = #tpu.pipeline_mode<synchronous>, transform_indices = @transform_5, window_bounds = array<i64: 256, 128>}, {pipeline_mode = #tpu.pipeline_mode<synchronous>, transform_indices = @transform_6, window_bounds = array<i64: 1, 128>}, {transform_indices = @transform_7, window_bounds = array<i64: 8, 128>}]} {
    %c0 = arith.constant 0 : index
    %c0_0 = arith.constant 0 : index
    %0 = vector.load %arg1[%c0, %c0_0] : memref<8x128xf32, #tpu.memory_space<vmem>>, vector<8x128xf32>
    %1 = arith.truncf %0 : vector<8x128xf32> to vector<8x128xbf16>
    %c0_1 = arith.constant 0 : index
    %c0_2 = arith.constant 0 : index
    %2 = vector.load %arg2[%c0_1, %c0_2] : memref<128x256xbf16, #tpu.memory_space<vmem>>, vector<128x256xbf16>
    %cst = arith.constant dense<0.000000e+00> : vector<8x256xf32>
    %3 = tpu.matmul %1, %2, %cst {dimension_numbers = #tpu.dot_dimension_numbers<[1], [0], [0], [1], [0, 0, 1, 1], [], []>} : vector<8x128xbf16>, vector<128x256xbf16>, vector<8x256xf32> -> vector<8x256xf32>
    %c0_3 = arith.constant 0 : index
    %c0_4 = arith.constant 0 : index
    %4 = vector.load %arg3[%c0_3, %c0_4] : memref<1x256xf32, #tpu.memory_space<vmem>>, vector<1x256xf32>
    %5 = vector.broadcast %4 : vector<1x256xf32> to vector<8x256xf32>
    %6 = arith.addf %3, %5 : vector<8x256xf32>
    %cst_5 = arith.constant 0.000000e+00 : f32
    %7 = vector.broadcast %cst_5 : f32 to vector<8x256xf32>
    %8 = arith.maximumf %6, %7 : vector<8x256xf32>
    %9 = arith.truncf %8 : vector<8x256xf32> to vector<8x256xbf16>
    %c0_6 = arith.constant 0 : index
    %c0_7 = arith.constant 0 : index
    %10 = vector.load %arg4[%c0_6, %c0_7] : memref<256x256xbf16, #tpu.memory_space<vmem>>, vector<256x256xbf16>
    %cst_8 = arith.constant dense<0.000000e+00> : vector<8x256xf32>
    %11 = tpu.matmul %9, %10, %cst_8 {dimension_numbers = #tpu.dot_dimension_numbers<[1], [0], [0], [1], [0, 0, 1, 1], [], []>} : vector<8x256xbf16>, vector<256x256xbf16>, vector<8x256xf32> -> vector<8x256xf32>
    %c0_9 = arith.constant 0 : index
    %c0_10 = arith.constant 0 : index
    %12 = vector.load %arg5[%c0_9, %c0_10] : memref<1x256xf32, #tpu.memory_space<vmem>>, vector<1x256xf32>
    %13 = vector.broadcast %12 : vector<1x256xf32> to vector<8x256xf32>
    %14 = arith.addf %11, %13 : vector<8x256xf32>
    %cst_11 = arith.constant 0.000000e+00 : f32
    %15 = vector.broadcast %cst_11 : f32 to vector<8x256xf32>
    %16 = arith.maximumf %14, %15 : vector<8x256xf32>
    %17 = arith.truncf %16 : vector<8x256xf32> to vector<8x256xbf16>
    %c0_12 = arith.constant 0 : index
    %c0_13 = arith.constant 0 : index
    %18 = vector.load %arg6[%c0_12, %c0_13] : memref<256x128xbf16, #tpu.memory_space<vmem>>, vector<256x128xbf16>
    %cst_14 = arith.constant dense<0.000000e+00> : vector<8x128xf32>
    %19 = tpu.matmul %17, %18, %cst_14 {dimension_numbers = #tpu.dot_dimension_numbers<[1], [0], [0], [1], [0, 0, 1, 1], [], []>} : vector<8x256xbf16>, vector<256x128xbf16>, vector<8x128xf32> -> vector<8x128xf32>
    %c0_15 = arith.constant 0 : index
    %c0_16 = arith.constant 0 : index
    %20 = vector.load %arg7[%c0_15, %c0_16] : memref<1x128xf32, #tpu.memory_space<vmem>>, vector<1x128xf32>
    %21 = vector.broadcast %20 : vector<1x128xf32> to vector<8x128xf32>
    %22 = arith.addf %19, %21 : vector<8x128xf32>
    %23 = math.tanh %22 : vector<8x128xf32>
    %c0_17 = arith.constant 0 : index
    %c0_18 = arith.constant 0 : index
    %24 = vector.load %arg8[%c0_17, %c0_18] : memref<8x128xf32, #tpu.memory_space<vmem>>, vector<8x128xf32>
    tpu.vector_store %arg8[%c0_17, %c0_18], %23 {strides = array<i32>} : memref<8x128xf32, #tpu.memory_space<vmem>>, vector<8x128xf32>,
    return
  }
  func.func @transform_0(%arg0: i32) -> (i32, i32) {
    %c0_i32 = arith.constant 0 : i32
    %c0_i32_0 = arith.constant 0 : i32
    return %arg0, %c0_i32 : i32, i32
  }
  func.func @transform_1(%arg0: i32) -> (i32, i32) {
    %c0_i32 = arith.constant 0 : i32
    %c0_i32_0 = arith.constant 0 : i32
    %c0_i32_1 = arith.constant 0 : i32
    return %c0_i32, %c0_i32_0 : i32, i32
  }
  func.func @transform_2(%arg0: i32) -> (i32, i32) {
    %c0_i32 = arith.constant 0 : i32
    %c0_i32_0 = arith.constant 0 : i32
    %c0_i32_1 = arith.constant 0 : i32
    return %c0_i32, %c0_i32_0 : i32, i32
  }
  func.func @transform_3(%arg0: i32) -> (i32, i32) {
    %c0_i32 = arith.constant 0 : i32
    %c0_i32_0 = arith.constant 0 : i32
    %c0_i32_1 = arith.constant 0 : i32
    return %c0_i32, %c0_i32_0 : i32, i32
  }
  func.func @transform_4(%arg0: i32) -> (i32, i32) {
    %c0_i32 = arith.constant 0 : i32
    %c0_i32_0 = arith.constant 0 : i32
    %c0_i32_1 = arith.constant 0 : i32
    return %c0_i32, %c0_i32_0 : i32, i32
  }
  func.func @transform_5(%arg0: i32) -> (i32, i32) {
    %c0_i32 = arith.constant 0 : i32
    %c0_i32_0 = arith.constant 0 : i32
    %c0_i32_1 = arith.constant 0 : i32
    return %c0_i32, %c0_i32_0 : i32, i32
  }
  func.func @transform_6(%arg0: i32) -> (i32, i32) {
    %c0_i32 = arith.constant 0 : i32
    %c0_i32_0 = arith.constant 0 : i32
    %c0_i32_1 = arith.constant 0 : i32
    return %c0_i32, %c0_i32_0 : i32, i32
  }
  func.func @transform_7(%arg0: i32) -> (i32, i32) {
    %c0_i32 = arith.constant 0 : i32
    %c0_i32_0 = arith.constant 0 : i32
    return %arg0, %c0_i32 : i32, i32
  }
}

</mosaic_0001>

<bundles_post_ra>
// kernel: tpu_custom_call.1
= control target key start
LH: loop header
LB: loop body
LE: loop exit
PB: predicated region body
PF: predicated region fallthrough
CT: control target
= control target key end

     0   :  { %12 = vsyncpa [#allocation3], 0  ;;  %s1227_s0 = inlined_call_operand.hbm [shape: f32[8,128], index: 0, kind: input, shape index: {}]   ;;  %s1228_s1 = inlined_call_operand.hbm [shape: bf16[128,256], index: 1, kind: input, shape index: {}]   ;;  %s1229_s2 = inlined_call_operand.hbm [shape: f32[1,256], index: 2, kind: input, shape index: {}]   ;;  %s1230_s3 = inlined_call_operand.hbm [shape: bf16[256,256], index: 3, kind: input, shape index: {}]   ;;  %s1231_s4 = inlined_call_operand.vmem [shape: f32[1,256], index: 4, kind: input, shape index: {}]   ;;  %s1232_s5 = inlined_call_operand.hbm [shape: bf16[256,128], index: 5, kind: input, shape index: {}]   ;;  %s1233_s6 = inlined_call_operand.vmem [shape: f32[1,128], index: 6, kind: input, shape index: {}]   ;;  %s1234_s7 = inlined_call_operand.hbm [shape: f32[8,128], index: 7, kind: output, shape index: {}]  }
   0x1   :  { %13 = vsyncpa [#allocation6], 0 }
   0x2   :  { %14 = vsyncpa [#allocation9], 0  ;;  %s31_s26 = sshll.u32 %s1228_s1, 4  ;;  %s32_s26 = int_to_ptr.hbm [resolvable:$true] %s31_s26 }
   0x3   :  { %15 = vsyncpa [#allocation4], 0  ;;  %s1153_s27 = smov [#allocation5]   ;;  %s55_s8 = sshll.u32 %s1230_s3, 4  ;;  %s56_s8 = int_to_ptr.hbm [resolvable:$true] %s55_s8 }
   0x4   :  { %s33_s28 = sshll.u32 %s1153_s27, 4  ;;  %s1154_s9 = smov 128   ;;  %s34_s28 = int_to_ptr.vmem [resolvable:$true] %s33_s28 }
   0x5   :  { %s1155_s10 = smov 8   ;;  %s1156_s11 = smov [#allocation8]  }
   0x6   :  { %39 = dma.hbm_to_vmem [thread:$0]  %s32_s26, 2048, %s34_s28, [#allocation6], %s1154_s9, %s1154_s9, %s1155_s10  }
   0x7   :  { %s57_s12 = sshll.u32 %s1156_s11, 4  ;;  %s21_s15 = sshll.u32 %s1227_s0, 4  ;;  %s58_s12 = int_to_ptr.vmem [resolvable:$true] %s57_s12  ;;  %s22_s15 = int_to_ptr.hbm [resolvable:$true] %s21_s15 }
   0x8   :  { %63 = dma.hbm_to_vmem [thread:$0]  %s56_s8, 4096, %s58_s12, [#allocation9], %s1154_s9, %s1154_s9, %s1155_s10  }
   0x9   :  { %s45_s17 = sshll.u32 %s1229_s2, 4  ;;  %s1157_s18 = smov [#allocation2]   ;;  %s46_s17 = int_to_ptr.hbm [resolvable:$true] %s45_s17 }
   0xa   :  { %s23_s19 = sshll.u32 %s1157_s18, 4  ;;  %s1158_s3 = smov [#allocation7]   ;;  %s24_s19 = int_to_ptr.vmem [resolvable:$true] %s23_s19 }
   0xb   :  { %26 = dma.hbm_to_vmem [thread:$0]  %s22_s15, 128, %s24_s19, [#allocation3]  }
   0xc   :  { %s47_s20 = sshll.u32 %s1158_s3, 4  ;;  %s70_s23 = sshll.u32 %s1232_s5, 4  ;;  %s48_s20 = int_to_ptr.vmem [resolvable:$true] %s47_s20  ;;  %s71_s23 = int_to_ptr.hbm [resolvable:$true] %s70_s23 }
   0xd   :  { %50 = dma.hbm_to_vmem [thread:$0]  %s46_s17, 32, %s48_s20, [#allocation6]  }
   0xe   :  { %s1159_s0 = smov [#allocation10]   ;;  %s1160_s25 = smov 64  }
   0xf   :  { %s72_s24 = sshll.u32 %s1159_s0, 4  ;;  %s1161_s26 = smov 4   ;;  %s73_s24 = int_to_ptr.vmem [resolvable:$true] %s72_s24 }
  0x10   :  { %78 = dma.hbm_to_vmem [thread:$0]  %s71_s23, 2048, %s73_s24, [#allocation9], %s1160_s25, %s1160_s25, %s1161_s26  }
  0x11   :  { %1145 = dma.done.wait [#allocation3], 128  }
  0x12   :  { %1146 = vsyncadd [#allocation3], 4294967168 }
  0x13   :  { %1147 = dma.done.wait [#allocation6], 2080  }
  0x14   :  { %1148 = vsyncadd [#allocation6], 4294965216 }
  0x15   :  { %1149 = dma.done.wait [#allocation9], 6144  }
  0x16   :  { %1150 = vsyncadd [#allocation9], 4294961152  ;;  %v726_v0 = vld [vmem:[#allocation5 + $0x70] sm:$0xf]  ;;  %v939_v1 = vld [vmem:[#allocation5 + $0x74] sm:$0xf0] }
  0x17   :  { %v938_v2 = vld [vmem:[#allocation5 + $0x74] sm:$0xf]  ;;  %v727_v3 = vor.u32 %v939_v1, %v726_v0  ;;  %v728_v4 = vld [vmem:[#allocation5 + $0x78] sm:$0xf0]  ;;  %v718_v5 = vld [vmem:[#allocation5 + $0x60] sm:$0xf] }
  0x18   :  { %v937_v6 = vld [vmem:[#allocation5 + $0x64] sm:$0xf0]  ;;  %v731_v7 = vor.u32 %v938_v2, %v728_v4  ;;  %v936_v8 = vld [vmem:[#allocation5 + $0x64] sm:$0xf]  ;;  %v720_v9 = vld [vmem:[#allocation5 + $0x68] sm:$0xf0] }
  0x19   :  { %205 = vmatpush.bf16.msra.mxu0 %v727_v3  ;;  %v719_v10 = vor.u32 %v937_v6, %v718_v5  ;;  %v723_v11 = vor.u32 %v936_v8, %v720_v9  ;;  %v710_v12 = vld [vmem:[#allocation5 + $0x50] sm:$0xf]  ;;  %v935_v13 = vld [vmem:[#allocation5 + $0x54] sm:$0xf0]  ;;  %v934_v14 = vld [vmem:[#allocation5 + $0x54] sm:$0xf] }
  0x1a   :  { %218 = vmatpush.bf16.msra.mxu1 %v731_v7  ;;  %v712_v15 = vld [vmem:[#allocation5 + $0x58] sm:$0xf0]  ;;  %v711_v16 = vor.u32 %v935_v13, %v710_v12  ;;  %v702_v18 = vld [vmem:[#allocation5 + $0x40] sm:$0xf]  ;;  %v933_v19 = vld [vmem:[#allocation5 + $0x44] sm:$0xf0] }
  0x1b   :  { %v715_v17 = vor.u32 %v934_v14, %v712_v15  ;;  %v932_v20 = vld [vmem:[#allocation5 + $0x44] sm:$0xf]  ;;  %v704_v21 = vld [vmem:[#allocation5 + $0x48] sm:$0xf0]  ;;  %v703_v22 = vor.u32 %v933_v19, %v702_v18  ;;  %v790_v23 = vld [vmem:[#allocation8 + $0x70] sm:$0xf] }
  0x1c   :  { %v955_v24 = vld [vmem:[#allocation8 + $0x74] sm:$0xf0]  ;;  %v854_v25 = vld [vmem:[#allocation8 + $0xf0] sm:$0xf]  ;;  %v707_v26 = vor.u32 %v932_v20, %v704_v21  ;;  %v782_v34 = vld [vmem:[#allocation8 + $0x60] sm:$0xf] }
  0x1d   :  { %206 = vmatpush.bf16.msra.mxu0 %v719_v10  ;;  %v694_v27 = vld [vmem:[#allocation5 + $0x30] sm:$0xf]  ;;  %v931_v28 = vld [vmem:[#allocation5 + $0x34] sm:$0xf0]  ;;  %v791_v29 = vor.u32 %v955_v24, %v790_v23  ;;  %v930_v31 = vld [vmem:[#allocation5 + $0x34] sm:$0xf] }
  0x1e   :  { %219 = vmatpush.bf16.msra.mxu1 %v723_v11  ;;  %v971_v30 = vld [vmem:[#allocation8 + $0xf4] sm:$0xf0]  ;;  %v953_v35 = vld [vmem:[#allocation8 + $0x64] sm:$0xf0]  ;;  %v846_v36 = vld [vmem:[#allocation8 + $0xe0] sm:$0xf]  ;;  %v695_v38 = vor.u32 %v931_v28, %v694_v27 }
  0x1f   :  { %v696_v32 = vld [vmem:[#allocation5 + $0x38] sm:$0xf0]  ;;  %v855_v33 = vor.u32 %v971_v30, %v854_v25  ;;  %433 = vmatpush.bf16.msra.mxu2 %v791_v29  ;;  %v969_v37 = vld [vmem:[#allocation8 + $0xe4] sm:$0xf0]  ;;  %v686_v39 = vld [vmem:[#allocation5 + $0x20] sm:$0xf]  ;;  %v783_v41 = vor.u32 %v953_v35, %v782_v34 }
  0x20   :  { %v929_v40 = vld [vmem:[#allocation5 + $0x24] sm:$0xf0]  ;;  %v847_v42 = vor.u32 %v969_v37, %v846_v36  ;;  %v699_v43 = vor.u32 %v930_v31, %v696_v32  ;;  %v928_v44 = vld [vmem:[#allocation5 + $0x24] sm:$0xf]  ;;  %v774_v45 = vld [vmem:[#allocation8 + $0x50] sm:$0xf] }
  0x21   :  { %207 = vmatpush.bf16.msra.mxu0 %v711_v16  ;;  %446 = vmatpush.bf16.msra.mxu3 %v855_v33  ;;  %v951_v46 = vld [vmem:[#allocation8 + $0x54] sm:$0xf0]  ;;  %v688_v47 = vld [vmem:[#allocation5 + $0x28] sm:$0xf0]  ;;  %v838_v48 = vld [vmem:[#allocation8 + $0xd0] sm:$0xf]  ;;  %v687_v51 = vor.u32 %v929_v40, %v686_v39 }
  0x22   :  { %220 = vmatpush.bf16.msra.mxu1 %v715_v17  ;;  %v967_v49 = vld [vmem:[#allocation8 + $0xd4] sm:$0xf0]  ;;  %v775_v50 = vor.u32 %v951_v46, %v774_v45  ;;  %v678_v52 = vld [vmem:[#allocation5 + $0x10] sm:$0xf]  ;;  %v766_v54 = vld [vmem:[#allocation8 + $0x40] sm:$0xf]  ;;  %v691_v56 = vor.u32 %v928_v44, %v688_v47 }
  0x23   :  { %434 = vmatpush.bf16.msra.mxu2 %v783_v41  ;;  %v839_v53 = vor.u32 %v967_v49, %v838_v48  ;;  %v949_v55 = vld [vmem:[#allocation8 + $0x44] sm:$0xf0]  ;;  %v927_v57 = vld [vmem:[#allocation5 + $0x14] sm:$0xf0]  ;;  %v830_v58 = vld [vmem:[#allocation8 + $0xc0] sm:$0xf] }
  0x24   :  { %v965_v59 = vld [vmem:[#allocation8 + $0xc4] sm:$0xf0]  ;;  %v926_v60 = vld [vmem:[#allocation5 + $0x14] sm:$0xf]  ;;  %v680_v61 = vld [vmem:[#allocation5 + $0x18] sm:$0xf0]  ;;  %v767_v63 = vor.u32 %v949_v55, %v766_v54  ;;  %v679_v0 = vor.u32 %v927_v57, %v678_v52 }
  0x25   :  { %208 = vmatpush.bf16.msra.mxu0 %v703_v22  ;;  %447 = vmatpush.bf16.msra.mxu3 %v847_v42  ;;  %v670_v62 = vld [vmem:[#allocation5] sm:$0xf]  ;;  %v925_v1 = vld [vmem:[#allocation5 + $0x4] sm:$0xf0]  ;;  %v831_v2 = vor.u32 %v965_v59, %v830_v58  ;;  %v758_v3 = vld [vmem:[#allocation8 + $0x30] sm:$0xf]  ;;  %v683_v5 = vor.u32 %v926_v60, %v680_v61 }
  0x26   :  { %221 = vmatpush.bf16.msra.mxu1 %v707_v26  ;;  %v947_v4 = vld [vmem:[#allocation8 + $0x34] sm:$0xf0]  ;;  %v924_v6 = vld [vmem:[#allocation5 + $0x4] sm:$0xf]  ;;  %v822_v7 = vld [vmem:[#allocation8 + $0xb0] sm:$0xf]  ;;  %v671_v16 = vor.u32 %v925_v1, %v670_v62 }
  0x27   :  { %435 = vmatpush.bf16.msra.mxu2 %v775_v50  ;;  %v963_v8 = vld [vmem:[#allocation8 + $0xb4] sm:$0xf0]  ;;  %v672_v9 = vld [vmem:[#allocation5 + $0x8] sm:$0xf0]  ;;  %v954_v10 = vld [vmem:[#allocation8 + $0x74] sm:$0xf]  ;;  %v759_v15 = vor.u32 %v947_v4, %v758_v3 }
  0x28   :  { %v792_v11 = vld [vmem:[#allocation8 + $0x78] sm:$0xf0]  ;;  %v970_v13 = vld [vmem:[#allocation8 + $0xf4] sm:$0xf]  ;;  %v823_v17 = vor.u32 %v963_v8, %v822_v7  ;;  %v750_v18 = vld [vmem:[#allocation8 + $0x20] sm:$0xf]  ;;  %v675_v20 = vor.u32 %v924_v6, %v672_v9 }
  0x29   :  { %209 = vmatpush.bf16.msra.mxu0 %v695_v38  ;;  %448 = vmatpush.bf16.msra.mxu3 %v839_v53  ;;  %v101_v12 = vld [vmem:[#allocation2] sm:$0xff]  ;;  %v945_v19 = vld [vmem:[#allocation8 + $0x24] sm:$0xf0]  ;;  %v795_v21 = vor.u32 %v954_v10, %v792_v11  ;;  %v814_v22 = vld [vmem:[#allocation8 + $0xa0] sm:$0xf]  ;;  %s1162_s28 = smov [#allocation11]  }
  0x2a   :  { %222 = vmatpush.bf16.msra.mxu1 %v699_v43  ;;  %v856_v14 = vld [vmem:[#allocation8 + $0xf8] sm:$0xf0]  ;;  %v961_v23 = vld [vmem:[#allocation8 + $0xa4] sm:$0xf0]  ;;  %v952_v25 = vld [vmem:[#allocation8 + $0x64] sm:$0xf]  ;;  %v102_v27 = vpack.c.bf16 %v101_v12, %v101_v12  ;;  %v751_v30 = vor.u32 %v945_v19, %v750_v18 }
  0x2b   :  { %436 = vmatpush.bf16.msra.mxu2 %v767_v63  ;;  %v859_v24 = vor.u32 %v970_v13, %v856_v14  ;;  %v784_v26 = vld [vmem:[#allocation8 + $0x68] sm:$0xf0]  ;;  %v968_v28 = vld [vmem:[#allocation8 + $0xe4] sm:$0xf]  ;;  %v815_v31 = vor.u32 %v961_v23, %v814_v22  ;;  %v950_v34 = vld [vmem:[#allocation8 + $0x54] sm:$0xf] }
  0x2c   :  { %v848_v29 = vld [vmem:[#allocation8 + $0xe8] sm:$0xf0]  ;;  %v787_v32 = vor.u32 %v952_v25, %v784_v26  ;;  %v776_v35 = vld [vmem:[#allocation8 + $0x58] sm:$0xf0]  ;;  %v966_v36 = vld [vmem:[#allocation8 + $0xd4] sm:$0xf] }
  0x2d   :  { %210 = vmatpush.bf16.msra.mxu0 %v687_v51  ;;  %449 = vmatpush.bf16.msra.mxu3 %v831_v2  ;;  %v851_v33 = vor.u32 %v968_v28, %v848_v29  ;;  %v840_v37 = vld [vmem:[#allocation8 + $0xd8] sm:$0xf0]  ;;  %v779_v38 = vor.u32 %v950_v34, %v776_v35  ;;  %v948_v40 = vld [vmem:[#allocation8 + $0x44] sm:$0xf]  ;;  %v768_v41 = vld [vmem:[#allocation8 + $0x48] sm:$0xf0] }
  0x2e   :  { %223 = vmatpush.bf16.msra.mxu1 %v691_v56  ;;  %v843_v39 = vor.u32 %v966_v36, %v840_v37  ;;  %v964_v42 = vld [vmem:[#allocation8 + $0xc4] sm:$0xf]  ;;  %v832_v43 = vld [vmem:[#allocation8 + $0xc8] sm:$0xf0]  ;;  %v771_v44 = vor.u32 %v948_v40, %v768_v41  ;;  %v946_v46 = vld [vmem:[#allocation8 + $0x34] sm:$0xf] }
  0x2f   :  { %437 = vmatpush.bf16.msra.mxu2 %v759_v15  ;;  %v835_v45 = vor.u32 %v964_v42, %v832_v43  ;;  %v760_v47 = vld [vmem:[#allocation8 + $0x38] sm:$0xf0]  ;;  %v962_v48 = vld [vmem:[#allocation8 + $0xb4] sm:$0xf]  ;;  %v944_v52 = vld [vmem:[#allocation8 + $0x24] sm:$0xf] }
  0x30   :  { %v824_v49 = vld [vmem:[#allocation8 + $0xb8] sm:$0xf0]  ;;  %v763_v50 = vor.u32 %v946_v46, %v760_v47  ;;  %v752_v53 = vld [vmem:[#allocation8 + $0x28] sm:$0xf0]  ;;  %v960_v54 = vld [vmem:[#allocation8 + $0xa4] sm:$0xf] }
  0x31   :  { %211 = vmatpush.bf16.msra.mxu0 %v679_v0  ;;  %450 = vmatpush.bf16.msra.mxu3 %v823_v17  ;;  %v827_v51 = vor.u32 %v962_v48, %v824_v49  ;;  %v816_v55 = vld [vmem:[#allocation8 + $0xa8] sm:$0xf0]  ;;  %v755_v56 = vor.u32 %v944_v52, %v752_v53  ;;  %v742_v58 = vld [vmem:[#allocation8 + $0x10] sm:$0xf]  ;;  %v943_v59 = vld [vmem:[#allocation8 + $0x14] sm:$0xf0] }
  0x32   :  { %224 = vmatpush.bf16.msra.mxu1 %v683_v5  ;;  %v819_v57 = vor.u32 %v960_v54, %v816_v55  ;;  %v806_v60 = vld [vmem:[#allocation8 + $0x90] sm:$0xf]  ;;  %v743_v61 = vor.u32 %v943_v59, %v742_v58  ;;  %v959_v62 = vld [vmem:[#allocation8 + $0x94] sm:$0xf0]  ;;  %v942_v63 = vld [vmem:[#allocation8 + $0x14] sm:$0xf] }
  0x33   :  { %438 = vmatpush.bf16.msra.mxu2 %v751_v30  ;;  %v744_v0 = vld [vmem:[#allocation8 + $0x18] sm:$0xf0]  ;;  %v807_v1 = vor.u32 %v959_v62, %v806_v60  ;;  %v958_v3 = vld [vmem:[#allocation8 + $0x94] sm:$0xf]  ;;  %v734_v6 = vld [vmem:[#allocation8] sm:$0xf] }
  0x34   :  { %v747_v2 = vor.u32 %v942_v63, %v744_v0  ;;  %v808_v4 = vld [vmem:[#allocation8 + $0x98] sm:$0xf0]  ;;  %v941_v7 = vld [vmem:[#allocation8 + $0x4] sm:$0xf0]  ;;  %v798_v8 = vld [vmem:[#allocation8 + $0x80] sm:$0xf] }
  0x35   :  { %212 = vmatpush.bf16.msra.mxu0 %v671_v16  ;;  %451 = vmatpush.bf16.msra.mxu3 %v815_v31  ;;  %v811_v5 = vor.u32 %v958_v3, %v808_v4  ;;  %v735_v9 = vor.u32 %v941_v7, %v734_v6  ;;  %v957_v10 = vld [vmem:[#allocation8 + $0x84] sm:$0xf0]  ;;  %v940_v11 = vld [vmem:[#allocation8 + $0x4] sm:$0xf]  ;;  %v736_v12 = vld [vmem:[#allocation8 + $0x8] sm:$0xf0] }
  0x36   :  { %225 = vmatpush.bf16.msra.mxu1 %v675_v20  ;;  %v799_v13 = vor.u32 %v957_v10, %v798_v8  ;;  %v739_v14 = vor.u32 %v940_v11, %v736_v12  ;;  %v956_v15 = vld [vmem:[#allocation8 + $0x84] sm:$0xf]  ;;  %v800_v16 = vld [vmem:[#allocation8 + $0x88] sm:$0xf0]  ;;  %v987_v18 = vld [vmem:[#allocation10 + $0x78] sm:$0xff]  ;;  %s654_s29 = sshll.u32 %s1162_s28, 4  ;;  %s655_s29 = int_to_ptr.vmem [resolvable:$true] %s654_s29 }
  0x37   :  { %439 = vmatpush.bf16.msra.mxu2 %v743_v61  ;;  %v803_v17 = vor.u32 %v956_v15, %v800_v16  ;;  %v979_v19 = vld [vmem:[#allocation10 + $0x38] sm:$0xff]  ;;  %v986_v20 = vld [vmem:[#allocation10 + $0x70] sm:$0xff]  ;;  %v985_v22 = vld [vmem:[#allocation10 + $0x68] sm:$0xff]  ;;  %s656_s9 = sshll.u32 %s1234_s7, 4  ;;  %s657_s9 = int_to_ptr.hbm [resolvable:$true] %s656_s9 }
  0x38   :  { %213 = vmatmul.bf16.vlgmr.msra.gmra.mxu0 %v102_v27  ;;  %v977_v23 = vld [vmem:[#allocation10 + $0x28] sm:$0xff]  ;;  %v976_v25 = vld [vmem:[#allocation10 + $0x20] sm:$0xff]  ;;  %v983_v26 = vld [vmem:[#allocation10 + $0x58] sm:$0xff] }
  0x39   :  { %459 = vmatpush.bf16.msrb.mxu0 %v795_v21  ;;  %226 = vmatmul.bf16.vlgmr.msra.gmra.mxu1 %v102_v27  ;;  %v978_v21 = vld [vmem:[#allocation10 + $0x30] sm:$0xff]  ;;  %v119_v27 = vld [vmem:[#allocation7] sm:$0x3]  ;;  %v981_v42 = vld [vmem:[#allocation10 + $0x48] sm:$0xff] }
  0x3a   :  { %472 = vmatpush.bf16.msrb.mxu1 %v859_v24  ;;  %452 = vmatpush.bf16.msra.mxu3 %v807_v1  ;;  %v984_v24 = vld [vmem:[#allocation10 + $0x60] sm:$0xff]  ;;  %v982_v28 = vld [vmem:[#allocation10 + $0x50] sm:$0xff]  ;;  %v121_v29 = vperm.slane %v119_v27, 0  ;;  %v122_v30 = vperm.slane %v119_v27, 1  ;;  %v975_v41 = vld [vmem:[#allocation10 + $0x18] sm:$0xff] }
  0x3b   :  { %440 = vmatpush.bf16.msra.mxu2 %v735_v9  ;;  %v974_v43 = vld [vmem:[#allocation10 + $0x10] sm:$0xff]  ;;  %v972_v46 = vld [vmem:[#allocation10] sm:$0xff] }
  0x3c   :  { %v267_v47 = vld [vmem:[%s1231_s4] sm:$0x3] }
  0x3d   :  { %460 = vmatpush.bf16.msrb.mxu0 %v787_v32  ;;  %v270_v48 = vperm.slane %v267_v47, 1  ;;  %v269_v53 = vperm.slane %v267_v47, 0  ;;  %v998_v3 = vld [vmem:[%s1233_s6] ss:$0 sm:$0xff] }
  0x3e   :  { %473 = vmatpush.bf16.msrb.mxu1 %v851_v33  ;;  %453 = vmatpush.bf16.msra.mxu3 %v799_v13 }
  0x3f   :  { %621 = vmatpush.bf16.msrb.mxu2 %v979_v19 }
  0x41   :  { %461 = vmatpush.bf16.msrb.mxu0 %v779_v38 }
  0x42   :  { %474 = vmatpush.bf16.msrb.mxu1 %v843_v39  ;;  %634 = vmatpush.bf16.msrb.mxu3 %v987_v18 }
  0x43   :  { %622 = vmatpush.bf16.msrb.mxu2 %v978_v21 }
  0x45   :  { %462 = vmatpush.bf16.msrb.mxu0 %v771_v44  ;;  %v980_v44 = vld [vmem:[#allocation10 + $0x40] sm:$0xff] }
  0x46   :  { %475 = vmatpush.bf16.msrb.mxu1 %v835_v45  ;;  %635 = vmatpush.bf16.msrb.mxu3 %v986_v20  ;;  %v973_v45 = vld [vmem:[#allocation10 + $0x8] sm:$0xff] }
  0x47   :  { %623 = vmatpush.bf16.msrb.mxu2 %v977_v23 }
  0x49   :  { %463 = vmatpush.bf16.msrb.mxu0 %v763_v50 }
  0x4a   :  { %476 = vmatpush.bf16.msrb.mxu1 %v827_v51  ;;  %636 = vmatpush.bf16.msrb.mxu3 %v985_v22 }
  0x4b   :  { %624 = vmatpush.bf16.msrb.mxu2 %v976_v25 }
  0x4d   :  { %464 = vmatpush.bf16.msrb.mxu0 %v755_v56 }
  0x4e   :  { %477 = vmatpush.bf16.msrb.mxu1 %v819_v57  ;;  %637 = vmatpush.bf16.msrb.mxu3 %v984_v24 }
  0x4f   :  { %625 = vmatpush.bf16.msrb.mxu2 %v975_v41 }
  0x51   :  { %465 = vmatpush.bf16.msrb.mxu0 %v747_v2 }
  0x52   :  { %478 = vmatpush.bf16.msrb.mxu1 %v811_v5  ;;  %638 = vmatpush.bf16.msrb.mxu3 %v983_v26 }
  0x53   :  { %626 = vmatpush.bf16.msrb.mxu2 %v974_v43 }
  0x55   :  { %466 = vmatpush.bf16.msrb.mxu0 %v739_v14 }
  0x56   :  { %479 = vmatpush.bf16.msrb.mxu1 %v803_v17  ;;  %639 = vmatpush.bf16.msrb.mxu3 %v982_v28 }
  0x57   :  { %627 = vmatpush.bf16.msrb.mxu2 %v973_v45 }
  0x5a   :  { %640 = vmatpush.bf16.msrb.mxu3 %v981_v42 }
  0x5b   :  { %628 = vmatpush.bf16.msrb.mxu2 %v972_v46 }
  0x5e   :  { %641 = vmatpush.bf16.msrb.mxu3 %v980_v44 }
  0xb5   :  { %v214_v31 = vpop.f32.mrf.mxu0 }
  0xb6   :  { %v215_v32 = vadd.f32 %v214_v31, %v121_v29  ;;  %v227_v33 = vpop.f32.mrf.mxu1 }
  0xb7   :  { %v228_v34 = vadd.f32 %v227_v33, %v122_v30 }
  0xb8   :  { %v231_v35 = vmax.f32 %v215_v32, 0.0 }
  0xb9   :  { %v232_v36 = vmax.f32 %v228_v34, 0.0 }
  0xba   :  { %v233_v37 = vpack.c.bf16 %v231_v35, %v231_v35 }
  0xbb   :  { %v234_v38 = vpack.c.bf16 %v232_v36, %v232_v36 }
  0xbc   :  { %441 = vmatmul.bf16.vlgmr.msra.gmra.mxu2 %v233_v37  ;;  %467 = vmatmul.bf16.vlgmr.msrb.gmra.mxu0 %v233_v37 }
  0xbd   :  { %454 = vmatmul.bf16.vlgmr.msra.gmra.mxu3 %v234_v38  ;;  %480 = vmatmul.bf16.vlgmr.msrb.gmra.mxu1 %v234_v38  ;;  %v216_v39 = vpop.f32.mrf.mxu0 }
  0xbe   :  { %v229_v40 = vpop.f32.mrf.mxu1 }
 0x139   :  { %v468_v49 = vpop.f32.mrf.mxu0 }
 0x13a   :  { %v469_v50 = vadd.f32 %v468_v49, %v270_v48  ;;  %v481_v51 = vpop.f32.mrf.mxu1 }
 0x13c   :  { %v482_v52 = vadd.f32 %v481_v51, %v469_v50 }
 0x13e   :  { %v486_v54 = vmax.f32 %v482_v52, 0.0 }
 0x13f   :  { %v442_v55 = vpop.f32.mrf.mxu2 }
 0x140   :  { %v488_v56 = vpack.c.bf16 %v486_v54, %v486_v54  ;;  %v443_v57 = vadd.f32 %v442_v55, %v269_v53  ;;  %v455_v58 = vpop.f32.mrf.mxu3 }
 0x141   :  { %v470_v59 = vpop.f32.mrf.mxu0 }
 0x142   :  { %v456_v60 = vadd.f32 %v455_v58, %v443_v57  ;;  %v483_v61 = vpop.f32.mrf.mxu1  ;;  %642 = vmatmul.bf16.vlgmr.msrb.gmra.mxu3 %v488_v56 }
 0x144   :  { %v485_v62 = vmax.f32 %v456_v60, 0.0 }
 0x146   :  { %v487_v63 = vpack.c.bf16 %v485_v62, %v485_v62 }
 0x147   :  { %v444_v0 = vpop.f32.mrf.mxu2 }
 0x148   :  { %v457_v1 = vpop.f32.mrf.mxu3  ;;  %629 = vmatmul.bf16.vlgmr.msrb.gmra.mxu2 %v487_v63 }
 0x1c5   :  { %v643_v2 = vpop.f32.mrf.mxu3 }
 0x1cb   :  { %v630_v4 = vpop.f32.mrf.mxu2 }
 0x1cc   :  { %v631_v5 = vadd.f32 %v998_v3, %v630_v4 }
 0x1cd   :  { %v645_v6 = vpop.f32.mrf.mxu3 }
 0x1ce   :  { %v644_v7 = vadd.f32 %v643_v2, %v631_v5 }
 0x1d0   :  { %999 = vtanh.f32 %v644_v7 }
 0x1d3   :  { %v632_v8 = vpop.f32.mrf.mxu2 }
 0x1d6   :  { %v1000_v9 = vpop.eup %999 }
 0x1d7   :  { %648 = vst [vmem:[#allocation11] sm:$0xff] %v1000_v9 }
 0x1d8   :  { %659 = dma.vmem_to_hbm [thread:$0]  %s655_s29, 128, %s657_s9, [#allocation4]  }
 0x1d9   :  { %1151 = dma.done.wait [#allocation4], 128  }
 0x1da   :  { %1152 = vsyncadd [#allocation4], 4294967168 }
 0x1db   :  { %664 = vsyncpa [#allocation3], 1 }
 0x1dc   :  { %665 = vsyncpa [#allocation6], 1 }
 0x1dd   :  { %666 = vsyncpa [#allocation9], 1 }
 0x1de   :  { %667 = vsyncpa [#allocation4], 1 }

</bundles_post_ra>
